<compile_context>
chip_gen: v6e
topology: v6e:2x2x1
jax: 0.10.0
libtpu: 0.0.40
codegen_flags: <defaults>
</compile_context>

<pallas_src>
import functools

import jax
import jax.numpy as jnp
from jax.experimental import pallas as pl
from jax.experimental.pallas import tpu as pltpu

_LANE = 128
_MIB = 1024 * 1024


def _round_up(x, m):
    return ((x + m - 1) // m) * m


def _pad2(x, shape):
    pr = shape[0] - x.shape[0]
    pc = shape[1] - x.shape[1]
    if pr == 0 and pc == 0:
        return x
    return jnp.pad(x, ((0, pr), (0, pc)))


def _vmem_capacity_bytes():
    # Generation-aware: 128 MiB on v5e/v6e, 64 MiB per TensorCore on v7x.
    try:
        info = pltpu.get_tpu_info()
        cap = getattr(info, "vmem_capacity_bytes", None)
        if cap:
            return int(cap)
    except Exception:
        pass
    return 128 * _MIB


def _pick_te(e_p):
    # Stage-1 row tile: largest of these that divides E_p (E_p is a multiple of 128).
    for te in (1024, 512, 256, 128):
        if e_p % te == 0:
            return te
    return e_p


# ---------------------------------------------------------------------------
# Stage 1: hyperedge transform he_t = he @ w_fc + b_fc  (grid-invariant, done once)
# Output stored in bf16 so Stage 2's aggregation matmul runs on the bf16 MXU path.
# ---------------------------------------------------------------------------
def _hyperedge_transform_kernel(he_ref, wfc_ref, bfc_ref, out_ref):
    acc = (
        jnp.dot(he_ref[...], wfc_ref[...], preferred_element_type=jnp.float32)
        + bfc_ref[...]
    )
    out_ref[...] = acc.astype(out_ref.dtype)


# ---------------------------------------------------------------------------
# Stage 2: per-node-tile attention + aggregation (closed-form softmax)
# ---------------------------------------------------------------------------
def _inner_prop_tile_kernel(node_ref, mask_ref, het_ref, wwe_ref, bwe_ref,
                            ce_ref, out_ref, *, num_edges):
    node = node_ref[...]                                     # [TM, Din]  f32
    mask = mask_ref[...]                                     # [TM, E_p]  bf16 (exact 0/1)

    # Per-node score s = leaky_relu(node @ W_e + b_we) . c_e   (edge-independent)
    t = jnp.dot(node, wwe_ref[...], preferred_element_type=jnp.float32) + bwe_ref[...]
    t = jnp.where(t >= 0.0, t, 0.01 * t)
    s = jnp.sum(t * ce_ref[...], axis=-1, keepdims=True)     # [TM, 1]

    # Member count with f32 accumulation (exact for 0/1; padded columns are zero).
    k = jnp.sum(mask.astype(jnp.float32), axis=-1, keepdims=True)   # [TM, 1]

    # Closed-form softmax over the TRUE E edges: logits are s on the k member edges,
    # 0 on the (E - k) others.
    m = jnp.maximum(s, 0.0)
    es = jnp.exp(s - m)
    e0 = jnp.exp(-m)
    denom = k * es + (float(num_edges) - k) * e0
    w = es * pl.reciprocal(denom, approx=True)               # per-member attention weight

    # bf16 x bf16 -> f32 MXU aggregation; padded mask columns / he_t rows contribute 0.
    agg = jnp.dot(mask, het_ref[...], preferred_element_type=jnp.float32)  # [TM, Dout_p]
    out_ref[...] = jnp.maximum(w * agg, 0.0)


def _choose_tm(n, din, e_p, dout_p, vmem_limit):
    # Residents are double-buffered by Pallas even with constant index_maps.
    resident = 2 * (2 * e_p * dout_p            # he_t  (bf16)
                    + 4 * din * dout_p          # w_we  (f32)
                    + 2 * 4 * dout_p)           # b_we + c_e
    # Streamed per-row bytes (x2 double buffers) + in-kernel temporaries headroom.
    stream_per_row = 2 * (4 * din + 2 * e_p + 4 * dout_p)    # node + mask + out
    temp_per_row = 8 * dout_p + 4 * e_p                      # t/agg f32 + mask-reduce slack
    per_row = stream_per_row + temp_per_row
    budget = int(0.75 * vmem_limit) - resident - 4 * _MIB
    tm = max(16, budget // per_row)
    tm = min(2048, (tm // 16) * 16)
    if n <= tm:
        return max(16, _round_up(n, 16))
    return tm


def inner_propagation(node_emb, hyperedge_emb, mask, w_fc, b_fc, w_we, b_we, c_e,
                      *, tm=None):
    N, Din = node_emb.shape
    E, _ = hyperedge_emb.shape
    Dout = w_fc.shape[1]

    # Lane-dense padded dims.  E IS padded now (zero mask columns / he_t rows are
    # provably inert); num_edges=E (true count) is baked into the kernel.
    E_p = _round_up(E, _LANE)
    Dout_p = _round_up(Dout, _LANE)

    vmem_cap = _vmem_capacity_bytes()
    vmem_limit = min(vmem_cap - 16 * _MIB, int(vmem_cap * 0.8))

    # Avoid redundant casts; pad only what must be padded.
    node_f = node_emb if node_emb.dtype == jnp.float32 else node_emb.astype(jnp.float32)
    he_f = hyperedge_emb if hyperedge_emb.dtype == jnp.float32 else hyperedge_emb.astype(jnp.float32)

    he_p = _pad2(he_f, (E_p, Din))                              # rows padded, Din unpadded
    w_fc_p = _pad2(w_fc.astype(jnp.float32), (Din, Dout_p))
    w_we_p = _pad2(w_we.astype(jnp.float32), (Din, Dout_p))
    b_fc_p = _pad2(b_fc.reshape(1, Dout).astype(jnp.float32), (1, Dout_p))
    b_we_p = _pad2(b_we.reshape(1, Dout).astype(jnp.float32), (1, Dout_p))
    c_e_p = _pad2(c_e.reshape(1, Dout).astype(jnp.float32), (1, Dout_p))

    # --- Stage 1: he_t = he @ w_fc + b_fc, stored bf16 for Stage 2's MXU path ---
    TE = _pick_te(E_p)
    he_t = pl.pallas_call(
        _hyperedge_transform_kernel,
        out_shape=jax.ShapeDtypeStruct((E_p, Dout_p), jnp.bfloat16),
        grid=(E_p // TE,),
        in_specs=[pl.BlockSpec((TE, Din), lambda i: (i, 0)),
                  pl.BlockSpec((Din, Dout_p), lambda i: (0, 0)),
                  pl.BlockSpec((1, Dout_p), lambda i: (0, 0))],
        out_specs=pl.BlockSpec((TE, Dout_p), lambda i: (i, 0)),
        cost_estimate=pl.CostEstimate(
            flops=int(2 * E_p * Din * Dout_p),
            transcendentals=0,
            bytes_accessed=int(4 * (E_p * Din + Din * Dout_p + Dout_p)
                               + 2 * E_p * Dout_p)),
        compiler_params=pltpu.CompilerParams(
            dimension_semantics=("parallel",),
            vmem_limit_bytes=vmem_limit),
    )(he_p, w_fc_p, b_fc_p)

    # --- Stage 2: tile over nodes, pipelined + megacore-parallel ---
    TM = tm if tm is not None else _choose_tm(N, Din, E_p, Dout_p, vmem_limit)
    N_p = _round_up(N, TM)

    node_p = _pad2(node_f, (N_p, Din))                          # rows padded, Din unpadded
    # Cast to bf16 BEFORE padding: exact for 0/1 and halves the pad-pass HBM traffic.
    mask_bf = mask if mask.dtype == jnp.bfloat16 else mask.astype(jnp.bfloat16)
    mask_p = _pad2(mask_bf, (N_p, E_p))

    cost = pl.CostEstimate(
        flops=int(2 * N_p * Din * Dout_p + 2 * N_p * E_p * Dout_p + 6 * N_p * Dout_p),
        transcendentals=int(3 * N_p),
        bytes_accessed=int(4 * N_p * Din + 2 * N_p * E_p + 4 * N_p * Dout_p
                           + 2 * E_p * Dout_p + 4 * Din * Dout_p + 8 * Dout_p),
    )

    out_p = pl.pallas_call(
        functools.partial(_inner_prop_tile_kernel, num_edges=E),
        out_shape=jax.ShapeDtypeStruct((N_p, Dout_p), jnp.float32),
        grid=(N_p // TM,),
        in_specs=[
            pl.BlockSpec((TM, Din), lambda i: (i, 0)),        # node tile (streamed, unpadded Din)
            pl.BlockSpec((TM, E_p), lambda i: (i, 0)),        # mask tile (streamed, bf16, lane-dense)
            pl.BlockSpec((E_p, Dout_p), lambda i: (0, 0)),    # he_t    (VMEM-resident, bf16)
            pl.BlockSpec((Din, Dout_p), lambda i: (0, 0)),    # w_we    (VMEM-resident)
            pl.BlockSpec((1, Dout_p), lambda i: (0, 0)),      # b_we
            pl.BlockSpec((1, Dout_p), lambda i: (0, 0)),      # c_e
        ],
        out_specs=pl.BlockSpec((TM, Dout_p), lambda i: (i, 0)),
        compiler_params=pltpu.CompilerParams(
            dimension_semantics=("parallel",),
            vmem_limit_bytes=vmem_limit),
        cost_estimate=cost,
    )(node_p, mask_p, he_t, w_we_p, b_we_p, c_e_p)

    return out_p[:N, :Dout]


def _reference(node_emb, hyperedge_emb, mask, w_fc, b_fc, w_we, b_we, c_e):
    he_t = hyperedge_emb @ w_fc + b_fc
    t = node_emb @ w_we + b_we
    t = jnp.where(t >= 0.0, t, 0.01 * t)
    score = (t * c_e).sum(-1, keepdims=True)
    logits = mask * score
    attn = jax.nn.softmax(logits, axis=-1)
    agg = (attn * mask) @ he_t
    return jnp.maximum(agg, 0.0)


if __name__ == "__main__":
    # Small, deterministic synthetic setup (N nodes, E hyperedges).
    N, E, Din, Dout = 256, 64, 32, 32
    key = jax.random.PRNGKey(0)
    k_node, k_he, k_mask, k_wfc, k_bfc, k_wwe, k_bwe, k_ce = jax.random.split(key, 8)

    node_emb = jax.random.normal(k_node, (N, Din), dtype=jnp.float32)
    hyperedge_emb = jax.random.normal(k_he, (E, Din), dtype=jnp.float32)

    # membership mask [N, E]: 1.0 where node belongs to hyperedge
    # (dense stand-in for the hyperedge_to_nodes dict)
    mask = jax.random.bernoulli(k_mask, p=0.3, shape=(N, E)).astype(jnp.float32)

    # Parameter init (xavier-uniform-like weights stored as [Din, Dout]; biases uniform; c_e ~ N(0,1))
    limit = (6.0 / (Din + Dout)) ** 0.5
    w_fc = jax.random.uniform(k_wfc, (Din, Dout), minval=-limit, maxval=limit, dtype=jnp.float32)
    w_we = jax.random.uniform(k_wwe, (Din, Dout), minval=-limit, maxval=limit, dtype=jnp.float32)
    b_lim = 1.0 / (Din ** 0.5)
    b_fc = jax.random.uniform(k_bfc, (Dout,), minval=-b_lim, maxval=b_lim, dtype=jnp.float32)
    b_we = jax.random.uniform(k_bwe, (Dout,), minval=-b_lim, maxval=b_lim, dtype=jnp.float32)
    c_e = jax.random.normal(k_ce, (Dout,), dtype=jnp.float32)

    # tm=128 -> grid=(2,): exercises the pipelined / megacore-parallel node tiling.
    out = inner_propagation(node_emb, hyperedge_emb, mask, w_fc, b_fc, w_we, b_we, c_e, tm=128)
    out = jax.block_until_ready(out)

    ref = _reference(node_emb, hyperedge_emb, mask, w_fc, b_fc, w_we, b_we, c_e)
    assert out.shape == (N, Dout)
    # Tolerance covers bf16 he_t storage (~0.4% rel) and the EUP approx-reciprocal (~1e-4 rel).
    assert jnp.allclose(out, ref, atol=5e-3, rtol=1e-2), "mismatch vs reference"

    print("KERNEL_OK")
</pallas_src>

<mosaic_0001>
module attributes {stable_mosaic.version = 11 : i64} {
  func.func @_hyperedge_transform_kernel(%arg0: i32, %arg1: memref<128x32xf32, #tpu.memory_space<vmem>>, %arg2: memref<32x128xf32, #tpu.memory_space<vmem>>, %arg3: memref<1x128xf32, #tpu.memory_space<vmem>>, %arg4: memref<128x128xbf16, #tpu.memory_space<vmem>>) attributes {dimension_semantics = [#tpu.dimension_semantics<parallel>], iteration_bounds = array<i64: 1>, scalar_prefetch = 0 : i64, scratch_operands = 0 : i64, tpu.core_type = #tpu.core_type<tc>, window_params = [{transform_indices = @transform_0, window_bounds = array<i64: 128, 32>}, {pipeline_mode = #tpu.pipeline_mode<synchronous>, transform_indices = @transform_1, window_bounds = array<i64: 32, 128>}, {pipeline_mode = #tpu.pipeline_mode<synchronous>, transform_indices = @transform_2, window_bounds = array<i64: 1, 128>}, {transform_indices = @transform_3, window_bounds = array<i64: 128, 128>}]} {
    %c0 = arith.constant 0 : index
    %c0_0 = arith.constant 0 : index
    %0 = vector.load %arg1[%c0, %c0_0] : memref<128x32xf32, #tpu.memory_space<vmem>>, vector<128x32xf32>
    %c0_1 = arith.constant 0 : index
    %c0_2 = arith.constant 0 : index
    %1 = vector.load %arg2[%c0_1, %c0_2] : memref<32x128xf32, #tpu.memory_space<vmem>>, vector<32x128xf32>
    %cst = arith.constant dense<0.000000e+00> : vector<128x128xf32>
    %2 = tpu.matmul %0, %1, %cst {dimension_numbers = #tpu.dot_dimension_numbers<[1], [0], [0], [1], [0, 0, 1, 1], [], []>} : vector<128x32xf32>, vector<32x128xf32>, vector<128x128xf32> -> vector<128x128xf32>
    %c0_3 = arith.constant 0 : index
    %c0_4 = arith.constant 0 : index
    %3 = vector.load %arg3[%c0_3, %c0_4] : memref<1x128xf32, #tpu.memory_space<vmem>>, vector<1x128xf32>
    %4 = vector.broadcast %3 : vector<1x128xf32> to vector<128x128xf32>
    %5 = arith.addf %2, %4 : vector<128x128xf32>
    %6 = arith.truncf %5 : vector<128x128xf32> to vector<128x128xbf16>
    %c0_5 = arith.constant 0 : index
    %c0_6 = arith.constant 0 : index
    %7 = vector.load %arg4[%c0_5, %c0_6] : memref<128x128xbf16, #tpu.memory_space<vmem>>, vector<128x128xbf16>
    tpu.vector_store %arg4[%c0_5, %c0_6], %6 {strides = array<i32>} : memref<128x128xbf16, #tpu.memory_space<vmem>>, vector<128x128xbf16>,
    return
  }
  func.func @transform_0(%arg0: i32) -> (i32, i32) {
    %c0_i32 = arith.constant 0 : i32
    %c0_i32_0 = arith.constant 0 : i32
    return %arg0, %c0_i32 : i32, i32
  }
  func.func @transform_1(%arg0: i32) -> (i32, i32) {
    %c0_i32 = arith.constant 0 : i32
    %c0_i32_0 = arith.constant 0 : i32
    %c0_i32_1 = arith.constant 0 : i32
    return %c0_i32, %c0_i32_0 : i32, i32
  }
  func.func @transform_2(%arg0: i32) -> (i32, i32) {
    %c0_i32 = arith.constant 0 : i32
    %c0_i32_0 = arith.constant 0 : i32
    %c0_i32_1 = arith.constant 0 : i32
    return %c0_i32, %c0_i32_0 : i32, i32
  }
  func.func @transform_3(%arg0: i32) -> (i32, i32) {
    %c0_i32 = arith.constant 0 : i32
    %c0_i32_0 = arith.constant 0 : i32
    return %arg0, %c0_i32 : i32, i32
  }
}

</mosaic_0001>

<bundles_post_ra>
// kernel: tpu_custom_call.1
= control target key start
LH: loop header
LB: loop body
LE: loop exit
PB: predicated region body
PF: predicated region fallthrough
CT: control target
= control target key end

     0   :  { %vm42_vm0 = vcmask 261120   ;;  %s618_s0 = inlined_call_operand.vmem [shape: f32[128,32], index: 0, kind: input, shape index: {}]   ;;  %s619_s1 = inlined_call_operand.vmem [shape: f32[32,128], index: 1, kind: input, shape index: {}]   ;;  %s620_s2 = inlined_call_operand.vmem [shape: f32[1,128], index: 2, kind: input, shape index: {}]   ;;  %s621_s3 = inlined_call_operand.hbm [shape: bf16[128,128], index: 3, kind: output, shape index: {}]  }
   0x1   :  { %v34_v0 = vld [vmem:[%s619_s1 + $0x18] sm:$0xff]  ;;  %v33_v1 = vld [vmem:[%s619_s1 + $0x10] sm:$0xff]  ;;  %v32_v2 = vld [vmem:[%s619_s1 + $0x8] sm:$0xff] }
   0x2   :  { %448 = vmatprep.subr.mxu0 %v34_v0  ;;  %480 = vmatprep.subr.mxu1 %v34_v0  ;;  %v31_v3 = vld [vmem:[%s619_s1] sm:$0xff] }
   0x3   :  { %449 = vmatpush3.msra.mxu0 %v34_v0  ;;  %484 = vmatpush3.msra.mxu1 %v34_v0  ;;  %v15_v4 = vld [vmem:[%s618_s0] sm:$0xff] }
   0x4   :  { %450 = vmatprep.subr.mxu0 %v33_v1  ;;  %481 = vmatprep.subr.mxu1 %v33_v1  ;;  %v23_v5 = vld [vmem:[%s618_s0 + $0x40] sm:$0xff] }
   0x5   :  { %451 = vmatpush3.msra.mxu0 %v33_v1  ;;  %485 = vmatpush3.msra.mxu1 %v33_v1 }
   0x6   :  { %452 = vmatprep.subr.mxu0 %v32_v2  ;;  %482 = vmatprep.subr.mxu1 %v32_v2 }
   0x7   :  { %453 = vmatpush3.msra.mxu0 %v32_v2  ;;  %486 = vmatpush3.msra.mxu1 %v32_v2 }
   0x8   :  { %8 = vsyncpa [#allocation3], 0  ;;  %454 = vmatprep.subr.mxu0 %v31_v3  ;;  %483 = vmatprep.subr.mxu1 %v31_v3  ;;  %v16_v6 = vld [vmem:[%s618_s0 + $0x8] sm:$0xff]  ;;  %v17_v8 = vld [vmem:[%s618_s0 + $0x10] sm:$0xff] }
   0x9   :  { %v24_v7 = vld [vmem:[%s618_s0 + $0x48] sm:$0xff]  ;;  %455 = vmatpush3.msra.mxu0 %v31_v3  ;;  %487 = vmatpush3.msra.mxu1 %v31_v3  ;;  %v25_v9 = vld [vmem:[%s618_s0 + $0x50] sm:$0xff]  ;;  %v18_v10 = vld [vmem:[%s618_s0 + $0x18] sm:$0xff] }
   0xa   :  { %456 = vmatprep.mubr.msk.f32.mxu0 %vm42_vm0, %v15_v4  ;;  %468 = vmatprep.mubr.msk.f32.mxu1 %vm42_vm0, %v23_v5  ;;  %v26_v11 = vld [vmem:[%s618_s0 + $0x58] sm:$0xff]  ;;  %v19_v12 = vld [vmem:[%s618_s0 + $0x20] sm:$0xff]  ;;  %v20_v14 = vld [vmem:[%s618_s0 + $0x28] sm:$0xff] }
   0xb   :  { %457 = vmatmul.mubr.msk.f32.vlgmr.msra.gmra.mxu0 %vm42_vm0, %v16_v6  ;;  %469 = vmatmul.mubr.msk.f32.vlgmr.msra.gmra.mxu1 %vm42_vm0, %v24_v7  ;;  %v27_v13 = vld [vmem:[%s618_s0 + $0x60] sm:$0xff]  ;;  %v28_v15 = vld [vmem:[%s618_s0 + $0x68] sm:$0xff]  ;;  %v21_v16 = vld [vmem:[%s618_s0 + $0x30] sm:$0xff] }
   0xc   :  { %459 = vmatprep.mubr.msk.f32.mxu0 %vm42_vm0, %v17_v8  ;;  %471 = vmatprep.mubr.msk.f32.mxu1 %vm42_vm0, %v25_v9  ;;  %v29_v17 = vld [vmem:[%s618_s0 + $0x70] sm:$0xff]  ;;  %v22_v18 = vld [vmem:[%s618_s0 + $0x38] sm:$0xff]  ;;  %v332_v21 = vld [vmem:[%s620_s2] ss:$0 sm:$0xff] }
   0xd   :  { %v30_v19 = vld [vmem:[%s618_s0 + $0x78] sm:$0xff]  ;;  %s513_s0 = smov [#allocation2]  }
   0xe   :  { %s321_s2 = sshll.u32 %s513_s0, 4  ;;  %s322_s2 = int_to_ptr.vmem [resolvable:$true] %s321_s2 }
   0xf   :  { %460 = vmatmul.mubr.msk.f32.gmra.mxu0 %vm42_vm0, %v18_v10  ;;  %472 = vmatmul.mubr.msk.f32.gmra.mxu1 %vm42_vm0, %v26_v11  ;;  %s491_s1 = scalar_lea.vmem %s322_s2, 1024  ;;  %p496_p1 = scmp.lt.s32.totalorder %s322_s2, %s322_s2 }
  0x10   :  { %462 = vmatprep.mubr.msk.f32.mxu0 %vm42_vm0, %v19_v12  ;;  %474 = vmatprep.mubr.msk.f32.mxu1 %vm42_vm0, %v27_v13  ;;  %p492_p0 = scmp.ne.s32.totalorder %s322_s2, %s491_s1  ;;  %p497_p2 = scmp.lt.s32.totalorder %s491_s1, %s491_s1 }
  0x12   :  { %p498_p3 = por %p497_p2, %p496_p1 }
  0x13   :  { %463 = vmatmul.mubr.msk.f32.gmra.mxu0 %vm42_vm0, %v20_v14  ;;  %475 = vmatmul.mubr.msk.f32.gmra.mxu1 %vm42_vm0, %v28_v15 }
  0x14   :  { %465 = vmatprep.mubr.msk.f32.mxu0 %vm42_vm0, %v21_v16  ;;  %477 = vmatprep.mubr.msk.f32.mxu1 %vm42_vm0, %v29_v17  ;;  %p499_p4 = pnand %p498_p3, %p492_p0 }
  0x17   :  { %466 = vmatmul.mubr.msk.f32.gmra.mxu0 %vm42_vm0, %v22_v18  ;;  %478 = vmatmul.mubr.msk.f32.gmra.mxu1 %vm42_vm0, %v30_v19 }
  0xcb   :  { %v458_v20 = vpop.f32.mrf.mxu0  ;;  %v470_v22 = vpop.f32.mrf.mxu1 }
  0xcc   :  { %v163_v25 = vadd.f32 %v458_v20, %v332_v21  ;;  %v203_v26 = vadd.f32 %v470_v22, %v332_v21 }
  0xcd   :  { %v157_v23 = vpop.f32.mrf.mxu0  ;;  %v197_v24 = vpop.f32.mrf.mxu1 }
  0xce   :  { %v158_v27 = vadd.f32 %v332_v21, %v157_v23  ;;  %v198_v28 = vadd.f32 %v332_v21, %v197_v24 }
  0xcf   :  { %v461_v29 = vpop.f32.mrf.mxu0  ;;  %v473_v30 = vpop.f32.mrf.mxu1 }
  0xd0   :  { %v384_v31 = vpack.c.bf16 %v163_v25, %v158_v27  ;;  %v404_v32 = vpack.c.bf16 %v203_v26, %v198_v28  ;;  %v173_v35 = vadd.f32 %v461_v29, %v332_v21  ;;  %v213_v36 = vadd.f32 %v473_v30, %v332_v21 }
  0xd1   :  { %v167_v33 = vpop.f32.mrf.mxu0  ;;  %v207_v34 = vpop.f32.mrf.mxu1 }
  0xd2   :  { %385 = vst [vmem:[#allocation2] sm:$0xff] %v384_v31   ;;  %424 = vst [vmem:[#allocation2 + $0x20] sm:$0xff] %v404_v32   ;;  %v168_v37 = vadd.f32 %v332_v21, %v167_v33  ;;  %v208_v38 = vadd.f32 %v332_v21, %v207_v34 }
  0xd3   :  { %v464_v39 = vpop.f32.mrf.mxu0  ;;  %v476_v40 = vpop.f32.mrf.mxu1 }
  0xd4   :  { %v389_v41 = vpack.c.bf16 %v173_v35, %v168_v37  ;;  %v409_v42 = vpack.c.bf16 %v213_v36, %v208_v38  ;;  %v183_v45 = vadd.f32 %v464_v39, %v332_v21  ;;  %v223_v46 = vadd.f32 %v476_v40, %v332_v21 }
  0xd5   :  { %v177_v43 = vpop.f32.mrf.mxu0  ;;  %v217_v44 = vpop.f32.mrf.mxu1 }
  0xd6   :  { %421 = vst [vmem:[#allocation2 + $0x8] sm:$0xff] %v389_v41   ;;  %425 = vst [vmem:[#allocation2 + $0x28] sm:$0xff] %v409_v42   ;;  %v178_v47 = vadd.f32 %v332_v21, %v177_v43  ;;  %v218_v48 = vadd.f32 %v332_v21, %v217_v44 }
  0xd7   :  { %v467_v49 = vpop.f32.mrf.mxu0  ;;  %v479_v50 = vpop.f32.mrf.mxu1 }
  0xd8   :  { %v394_v51 = vpack.c.bf16 %v183_v45, %v178_v47  ;;  %v414_v52 = vpack.c.bf16 %v223_v46, %v218_v48  ;;  %v193_v55 = vadd.f32 %v467_v49, %v332_v21  ;;  %v233_v56 = vadd.f32 %v479_v50, %v332_v21 }
  0xd9   :  { %v187_v53 = vpop.f32.mrf.mxu0  ;;  %v227_v54 = vpop.f32.mrf.mxu1 }
  0xda   :  { %422 = vst [vmem:[#allocation2 + $0x10] sm:$0xff] %v394_v51   ;;  %426 = vst [vmem:[#allocation2 + $0x30] sm:$0xff] %v414_v52   ;;  %v188_v57 = vadd.f32 %v332_v21, %v187_v53  ;;  %v228_v58 = vadd.f32 %v332_v21, %v227_v54 }
  0xdc   :  { %v399_v59 = vpack.c.bf16 %v193_v55, %v188_v57  ;;  %v419_v60 = vpack.c.bf16 %v233_v56, %v228_v58 }
  0xde   :  { %423 = vst [vmem:[#allocation2 + $0x18] sm:$0xff] %v399_v59   ;;  %427 = vst [vmem:[#allocation2 + $0x38] sm:$0xff] %v419_v60  }
  0xdf   :  { %502 = shalt.err (!%p499_p4)
}
  0xe0   :  { %s514_s26 = smov 64   ;;  %s515_s27 = smov 4  }
  0xe1   :  { %327 = dma.vmem_to_hbm [thread:$0]  %s322_s2, 1024, %s621_s3, [#allocation3], %s514_s26, %s514_s26, %s515_s27  }
  0xe2   :  { %511 = dma.done.wait [#allocation3], 1024  }
  0xe3   :  { %512 = vsyncadd [#allocation3], 4294966272 }
  0xe4   :  { %331 = vsyncpa [#allocation3], 1 }

</bundles_post_ra>
